<compile_context>
chip_gen: v5e
topology: v5e:2x2
jax: 0.10.0
libtpu: 0.0.40
codegen_flags: <defaults>
</compile_context>

<pallas_src>
import math

import jax
import jax.numpy as jnp
from jax.experimental import pallas as pl
from jax.experimental.pallas import tpu as pltpu


def make_fixed_embedding_table(c_in: int, d_model: int) -> jnp.ndarray:
    """Replicates the PyTorch sinusoidal table exactly (d_model must be even)."""
    assert d_model % 2 == 0, "FixedEmbedding table assumes even d_model"
    position = jnp.arange(c_in, dtype=jnp.float32)[:, None]                 # (c_in, 1)
    div_term = jnp.exp(
        jnp.arange(0, d_model, 2, dtype=jnp.float32) * -(math.log(10000.0) / d_model)
    )                                                                       # (d_model/2,)
    w = jnp.zeros((c_in, d_model), dtype=jnp.float32)
    w = w.at[:, 0::2].set(jnp.sin(position * div_term))
    w = w.at[:, 1::2].set(jnp.cos(position * div_term))
    return w


def _round_up(a: int, b: int) -> int:
    return (a + b - 1) // b * b


def _fixed_embedding_kernel(idx_ref, wblk_ref, out_ref):
    # idx_ref  : (TM, pack)  int32   — pack consecutive lookup indices per packed row
    # wblk_ref : (pack*c_in, pack*d_model) f32 — block-diagonal table (resident in VMEM)
    # out_ref  : (TM, pack*d_model) f32 — lane-dense (>=128 lanes) output tile
    idx = idx_ref[...]                                               # (TM, pack)
    tm, pack = idx.shape
    kdim = wblk_ref.shape[0]
    c_in = kdim // pack

    # Offset each packed slot into its own c_in-sized segment of the block-diag table.
    seg = jax.lax.broadcasted_iota(jnp.int32, (tm, pack), 1)         # slot id 0..pack-1
    valid = (idx >= 0) & (idx < c_in)
    # Sentinel kdim never matches any column -> invalid/padded rows become zeros.
    idx_off = jnp.where(valid, idx + seg * c_in, kdim)               # (TM, pack)

    col = jax.lax.broadcasted_iota(jnp.int32, (tm, kdim), 1)         # (TM, K)
    onehot = jnp.zeros((tm, kdim), jnp.float32)
    for p in range(pack):                                            # static, small (<=16)
        onehot = onehot + (col == idx_off[:, p:p + 1]).astype(jnp.float32)

    # Exact f32 gather via MXU: each output element receives exactly one w entry.
    out_ref[...] = jnp.dot(onehot, wblk_ref[...],
                           preferred_element_type=jnp.float32)


def fixed_embedding(x: jnp.ndarray, w: jnp.ndarray, *, tm: int = 256) -> jnp.ndarray:
    """Equivalent of FixedEmbedding.forward(x): w[x] (no grad anyway)."""
    c_in, d_model = w.shape
    orig_shape = x.shape
    idx = x.reshape(-1).astype(jnp.int32)
    n = idx.shape[0]

    # Packing factor so the output tile is >=128 lanes wide (unmasked vst).
    if d_model < 128 and 128 % d_model == 0:
        pack = 128 // d_model
    else:
        pack = 1                                                     # already lane-dense enough
    kdim = pack * c_in
    ndim = pack * d_model

    # Block-diagonal table: slot p of a packed row reads rows [p*c_in, (p+1)*c_in)
    # and writes columns [p*d_model, (p+1)*d_model).
    wf = w.astype(jnp.float32)
    w_block = jnp.kron(jnp.eye(pack, dtype=jnp.float32), wf) if pack > 1 else wf

    # Tile sizing: tm packed rows per grid step (multiple of 8 for f32 sublanes).
    tm = max(8, _round_up(tm, 8))
    n_rows = _round_up(max(n, 1), pack) // pack
    tm_eff = min(tm, _round_up(n_rows, 8))
    n_rows_p = _round_up(n_rows, tm_eff)
    total = n_rows_p * pack

    idx_padded = jnp.pad(idx, (0, total - n)) if total != n else idx
    idx2d = idx_padded.reshape(n_rows_p, pack)                       # (rows, pack) int32

    grid = (n_rows_p // tm_eff,)

    cost = pl.CostEstimate(
        flops=int(2 * n_rows_p * kdim * ndim),
        transcendentals=0,
        bytes_accessed=int(idx2d.size * 4 + w_block.size * 4 + n_rows_p * ndim * 4),
    )

    out = pl.pallas_call(
        _fixed_embedding_kernel,
        out_shape=jax.ShapeDtypeStruct((n_rows_p, ndim), jnp.float32),
        grid_spec=pltpu.PrefetchScalarGridSpec(
            num_scalar_prefetch=0,
            grid=grid,
            in_specs=[
                pl.BlockSpec((tm_eff, pack), lambda i: (i, 0)),      # packed index block
                pl.BlockSpec((kdim, ndim), lambda i: (0, 0)),        # full (tiny) table, resident
            ],
            out_specs=pl.BlockSpec((tm_eff, ndim), lambda i: (i, 0)),
        ),
        compiler_params=pltpu.CompilerParams(
            dimension_semantics=("parallel",),                        # shard grid across TCs (v7x)
            vmem_limit_bytes=32 * 1024 * 1024,                        # explicit, safe on 64 MiB v7x
        ),
        cost_estimate=cost,
    )(idx2d, w_block)

    # Contiguous un-pack back to (N, d_model); slice off padding if any.
    out = out.reshape(n_rows_p * pack, d_model)
    if total != n:
        out = out[:n]
    return out.reshape(*orig_shape, d_model)


if __name__ == "__main__":
    c_in, d_model = 16, 32       # FixedEmbedding(c_in=16, d_model=32)
    batch, seq = 2, 8            # x: (B, T) integer indices in [0, c_in)

    key = jax.random.PRNGKey(0)
    x = jax.random.randint(key, (batch, seq), 0, c_in, dtype=jnp.int32)

    w = make_fixed_embedding_table(c_in, d_model)

    y = fixed_embedding(x, w)
    y = jax.block_until_ready(y)

    # Reference: plain embedding lookup (what nn.Embedding does).
    y_ref = jnp.take(w, x.reshape(-1), axis=0).reshape(batch, seq, d_model)

    assert y.shape == (batch, seq, d_model)
    assert y.dtype == jnp.float32
    assert jnp.allclose(y, y_ref, atol=1e-6), "mismatch vs reference lookup"

    print("KERNEL_OK")
</pallas_src>

<mosaic_0001>
module attributes {stable_mosaic.version = 11 : i64} {
  func.func @_fixed_embedding_kernel(%arg0: i32, %arg1: memref<8x4xi32, #tpu.memory_space<vmem>>, %arg2: memref<64x128xf32, #tpu.memory_space<vmem>>, %arg3: memref<8x128xf32, #tpu.memory_space<vmem>>) attributes {dimension_semantics = [#tpu.dimension_semantics<parallel>], iteration_bounds = array<i64: 1>, scalar_prefetch = 0 : i64, scratch_operands = 0 : i64, tpu.core_type = #tpu.core_type<tc>, window_params = [{transform_indices = @transform_0, window_bounds = array<i64: 8, 4>}, {pipeline_mode = #tpu.pipeline_mode<synchronous>, transform_indices = @transform_1, window_bounds = array<i64: 64, 128>}, {transform_indices = @transform_2, window_bounds = array<i64: 8, 128>}]} {
    %c0 = arith.constant 0 : index
    %c0_0 = arith.constant 0 : index
    %0 = vector.load %arg1[%c0, %c0_0] : memref<8x4xi32, #tpu.memory_space<vmem>>, vector<8x4xi32>
    %1 = tpu.iota {dimensions = array<i32: 1>} : vector<8x4xi32>
    %c0_i32 = arith.constant 0 : i32
    %2 = vector.broadcast %c0_i32 : i32 to vector<8x4xi32>
    %3 = arith.cmpi sge, %0, %2 : vector<8x4xi32>
    %c16_i32 = arith.constant 16 : i32
    %4 = vector.broadcast %c16_i32 : i32 to vector<8x4xi32>
    %5 = arith.cmpi slt, %0, %4 : vector<8x4xi32>
    %6 = arith.andi %3, %5 : vector<8x4xi1>
    %c16_i32_1 = arith.constant 16 : i32
    %7 = vector.broadcast %c16_i32_1 : i32 to vector<8x4xi32>
    %8 = arith.muli %1, %7 : vector<8x4xi32>
    %9 = arith.addi %0, %8 : vector<8x4xi32>
    %c64_i32 = arith.constant 64 : i32
    %10 = vector.broadcast %c64_i32 : i32 to vector<8x4xi32>
    %11 = arith.select %6, %9, %10 : vector<8x4xi1>, vector<8x4xi32>
    %12 = tpu.iota {dimensions = array<i32: 1>} : vector<8x64xi32>
    %cst = arith.constant 0.000000e+00 : f32
    %13 = vector.broadcast %cst : f32 to vector<8x64xf32>
    %14 = vector.extract_strided_slice %11 {offsets = [0, 0], sizes = [8, 1], strides = [1, 1]} : vector<8x4xi32> to vector<8x1xi32>
    %15 = vector.broadcast %14 : vector<8x1xi32> to vector<8x64xi32>
    %16 = arith.cmpi eq, %12, %15 : vector<8x64xi32>
    %17 = arith.extui %16 : vector<8x64xi1> to vector<8x64xi32>
    %18 = arith.sitofp %17 : vector<8x64xi32> to vector<8x64xf32>
    %19 = arith.addf %13, %18 : vector<8x64xf32>
    %20 = vector.extract_strided_slice %11 {offsets = [0, 1], sizes = [8, 1], strides = [1, 1]} : vector<8x4xi32> to vector<8x1xi32>
    %21 = vector.broadcast %20 : vector<8x1xi32> to vector<8x64xi32>
    %22 = arith.cmpi eq, %12, %21 : vector<8x64xi32>
    %23 = arith.extui %22 : vector<8x64xi1> to vector<8x64xi32>
    %24 = arith.sitofp %23 : vector<8x64xi32> to vector<8x64xf32>
    %25 = arith.addf %19, %24 : vector<8x64xf32>
    %26 = vector.extract_strided_slice %11 {offsets = [0, 2], sizes = [8, 1], strides = [1, 1]} : vector<8x4xi32> to vector<8x1xi32>
    %27 = vector.broadcast %26 : vector<8x1xi32> to vector<8x64xi32>
    %28 = arith.cmpi eq, %12, %27 : vector<8x64xi32>
    %29 = arith.extui %28 : vector<8x64xi1> to vector<8x64xi32>
    %30 = arith.sitofp %29 : vector<8x64xi32> to vector<8x64xf32>
    %31 = arith.addf %25, %30 : vector<8x64xf32>
    %32 = vector.extract_strided_slice %11 {offsets = [0, 3], sizes = [8, 1], strides = [1, 1]} : vector<8x4xi32> to vector<8x1xi32>
    %33 = vector.broadcast %32 : vector<8x1xi32> to vector<8x64xi32>
    %34 = arith.cmpi eq, %12, %33 : vector<8x64xi32>
    %35 = arith.extui %34 : vector<8x64xi1> to vector<8x64xi32>
    %36 = arith.sitofp %35 : vector<8x64xi32> to vector<8x64xf32>
    %37 = arith.addf %31, %36 : vector<8x64xf32>
    %c0_2 = arith.constant 0 : index
    %c0_3 = arith.constant 0 : index
    %38 = vector.load %arg2[%c0_2, %c0_3] : memref<64x128xf32, #tpu.memory_space<vmem>>, vector<64x128xf32>
    %cst_4 = arith.constant dense<0.000000e+00> : vector<8x128xf32>
    %39 = tpu.matmul %37, %38, %cst_4 {dimension_numbers = #tpu.dot_dimension_numbers<[1], [0], [0], [1], [0, 0, 1, 1], [], []>} : vector<8x64xf32>, vector<64x128xf32>, vector<8x128xf32> -> vector<8x128xf32>
    %c0_5 = arith.constant 0 : index
    %c0_6 = arith.constant 0 : index
    %40 = vector.load %arg3[%c0_5, %c0_6] : memref<8x128xf32, #tpu.memory_space<vmem>>, vector<8x128xf32>
    tpu.vector_store %arg3[%c0_5, %c0_6], %39 {strides = array<i32>} : memref<8x128xf32, #tpu.memory_space<vmem>>, vector<8x128xf32>,
    return
  }
  func.func @transform_0(%arg0: i32) -> (i32, i32) {
    %c0_i32 = arith.constant 0 : i32
    %c0_i32_0 = arith.constant 0 : i32
    return %arg0, %c0_i32 : i32, i32
  }
  func.func @transform_1(%arg0: i32) -> (i32, i32) {
    %c0_i32 = arith.constant 0 : i32
    %c0_i32_0 = arith.constant 0 : i32
    %c0_i32_1 = arith.constant 0 : i32
    return %c0_i32, %c0_i32_0 : i32, i32
  }
  func.func @transform_2(%arg0: i32) -> (i32, i32) {
    %c0_i32 = arith.constant 0 : i32
    %c0_i32_0 = arith.constant 0 : i32
    return %arg0, %c0_i32 : i32, i32
  }
}

</mosaic_0001>

<bundles_post_ra>
// kernel: tpu_custom_call.1
= control target key start
LH: loop header
LB: loop body
LE: loop exit
PB: predicated region body
PF: predicated region fallthrough
CT: control target
= control target key end

     0   :  { %7 = vsyncpa [#allocation3], 0  ;;  %s219_s0 = inlined_call_operand.vmem [shape: s32[8,4], index: 0, kind: input, shape index: {}]   ;;  %s220_s1 = inlined_call_operand.hbm [shape: f32[64,128], index: 1, kind: input, shape index: {}]   ;;  %s221_s2 = inlined_call_operand.hbm [shape: f32[8,128], index: 2, kind: output, shape index: {}]  }
   0x1   :  { %8 = vsyncpa [#allocation4], 0  ;;  %s15_s11 = sshll.u32 %s220_s1, 4  ;;  %s186_s12 = smov [#allocation2]   ;;  %s16_s11 = int_to_ptr.hbm [resolvable:$true] %s15_s11 }
   0x2   :  { %s17_s13 = sshll.u32 %s186_s12, 4  ;;  %s187_s14 = smov 128   ;;  %s18_s13 = int_to_ptr.vmem [resolvable:$true] %s17_s13 }
   0x3   :  { %s188_s15 = smov 8  }
   0x4   :  { %23 = dma.hbm_to_vmem [thread:$0]  %s16_s11, 1024, %s18_s13, [#allocation3], %s187_s14, %s187_s14, %s188_s15  }
   0x5   :  { %182 = dma.done.wait [#allocation3], 1024  }
   0x6   :  { %183 = vsyncadd [#allocation3], 4294966272  ;;  %v29_v0 = vlaneseq  ;;  %v189_v1 = vmov 0   ;;  %v190_v2 = vmov 2   ;;  %v28_v5 = vld [vmem:[%s219_s0] sm:$0xff]  ;;  %v191_v8 = vmov 1  }
   0x7   :  { %129 = vset.pattern.permute.xlu0 %v189_v1  ;;  %131 = vset.pattern.permute.xlu1 %v190_v2  ;;  %vm31_vm0 = vcmp.ge.s32.totalorder %v28_v5, 0  ;;  %vm32_vm1 = vcmp.lt.s32.totalorder %v28_v5, 16  ;;  %v192_v9 = vmov 3   ;;  %v72_v10 = vld [vmem:[#allocation2 + $0x38] sm:$0xff]  ;;  %v71_v11 = vld [vmem:[#allocation2 + $0x30] sm:$0xff]  ;;  %v70_v12 = vld [vmem:[#allocation2 + $0x28] sm:$0xff] }
   0x8   :  { %v30_v3 = vand.u32 127, %v29_v0  ;;  %vm33_vm2 = vmand %vm31_vm0, %vm32_vm1  ;;  %85 = vmatpush.msra.mxu0 %v72_v10  ;;  %v69_v13 = vld [vmem:[#allocation2 + $0x20] sm:$0xff]  ;;  %v68_v14 = vld [vmem:[#allocation2 + $0x18] sm:$0xff]  ;;  %v193_v22 = vmov 0.0   ;;  %vm73_vm7 = vcmask 523264   ;;  %s194_s0 = smov [#allocation5]  }
   0x9   :  { %v67_v15 = vld [vmem:[#allocation2 + $0x10] sm:$0xff]  ;;  %v66_v16 = vld [vmem:[#allocation2 + $0x8] sm:$0xff]  ;;  %v65_v17 = vld [vmem:[#allocation2] sm:$0xff]  ;;  %s103_s1 = sshll.u32 %s194_s0, 4  ;;  %s105_s20 = sshll.u32 %s221_s2, 4  ;;  %s104_s1 = int_to_ptr.vmem [resolvable:$true] %s103_s1  ;;  %s106_s20 = int_to_ptr.hbm [resolvable:$true] %s105_s20 }
   0xa   :  { %v34_v4 = vmul.u32 16, %v30_v3  ;;  %86 = vmatpush.msra.mxu0 %v71_v11 }
   0xc   :  { %v35_v6 = vadd.s32 %v34_v4, %v28_v5  ;;  %87 = vmatpush.msra.mxu0 %v70_v12 }
   0xe   :  { %v36_v7 = vsel %vm33_vm2, %v35_v6, 64  ;;  %88 = vmatpush.msra.mxu0 %v69_v13 }
   0xf   :  { %38 = vperm.xlu0 %129, %v36_v7   ;;  %52 = vperm.xlu1 %131, %v36_v7  }
  0x10   :  { %89 = vmatpush.msra.mxu0 %v68_v14 }
  0x12   :  { %90 = vmatpush.msra.mxu0 %v67_v15 }
  0x14   :  { %91 = vmatpush.msra.mxu0 %v66_v16 }
  0x16   :  { %92 = vmatpush.msra.mxu0 %v65_v17 }
  0x17   :  { %130 = vset.pattern.permute.xlu0 %v191_v8  ;;  %132 = vset.pattern.permute.xlu1 %v192_v9 }
  0x18   :  { %45 = vperm.xlu0 %130, %v36_v7   ;;  %59 = vperm.xlu1 %132, %v36_v7  }
  0x20   :  { %133 = vset.pattern.permute.xlu0 %v192_v9 }
  0x81   :  { %v39_v18 = vpop.permute.xlu0 %38  ;;  %v53_v19 = vpop.permute.xlu1 %52 }
  0x82   :  { %vm40_vm3 = vcmp.eq.s32.totalorder %v30_v3, %v39_v18  ;;  %vm54_vm4 = vcmp.eq.s32.totalorder %v30_v3, %v53_v19 }
  0x83   :  { %v115_v23 = vsel %vm40_vm3, 1.0, %v193_v22  ;;  %v117_v26 = vsel %vm54_vm4, 1.0, %v193_v22 }
  0x8a   :  { %v46_v20 = vpop.permute.xlu0 %45  ;;  %v60_v21 = vpop.permute.xlu1 %59 }
  0x8b   :  { %vm47_vm5 = vcmp.eq.s32.totalorder %v30_v3, %v46_v20  ;;  %vm61_vm6 = vcmp.eq.s32.totalorder %v30_v3, %v60_v21 }
  0x8c   :  { %v116_v24 = vsel %vm47_vm5, 1.0, %v193_v22  ;;  %v118_v27 = vsel %vm61_vm6, 1.0, %v193_v22 }
  0x8d   :  { %v50_v25 = vadd.f32 %v116_v24, %v115_v23 }
  0x8f   :  { %v57_v28 = vadd.f32 %v117_v26, %v50_v25 }
  0x91   :  { %v64_v29 = vadd.f32 %v118_v27, %v57_v28 }
  0x93   :  { %119 = vmatmul.msk.f32.vlgmr.msra.gmra.mxu0 %vm73_vm7, %v64_v29 }
 0x110   :  { %v94_v30 = vpop.f32.mrf.mxu0 }
 0x111   :  { %97 = vst [vmem:[#allocation5] sm:$0xff] %v94_v30 }
 0x112   :  { %108 = dma.vmem_to_hbm [thread:$0]  %s104_s1, 128, %s106_s20, [#allocation4]  }
 0x113   :  { %184 = dma.done.wait [#allocation4], 128  }
 0x114   :  { %185 = vsyncadd [#allocation4], 4294967168 }
 0x115   :  { %113 = vsyncpa [#allocation3], 1 }
 0x116   :  { %114 = vsyncpa [#allocation4], 1 }

</bundles_post_ra>
